<compile_context>
chip_gen: v7x
topology: tpu7x:2x2x1
jax: 0.10.0
libtpu: 0.0.40
codegen_flags: <defaults>
</compile_context>

<pallas_src>
import jax
import jax.numpy as jnp
from jax.experimental import pallas as pl
from jax.experimental.pallas import tpu as pltpu


def _self_attention_kernel(x_ref, kp_ref, wq_ref, bq_ref, wkv_ref, bkv_ref, o_ref):
    # x_ref:  (Bt, N, in_dim)   kp_ref:  (Bt, M, in_dim)
    # wq_ref: (in_dim, D)       bq_ref:  (1, D)
    # wkv_ref:(in_dim, 2*D)     bkv_ref: (1, 2*D)
    # o_ref:  (Bt, N, D)
    bt, n, in_dim = x_ref.shape
    m = kp_ref.shape[1]
    d = wq_ref.shape[1]

    # Fold the batch into the row axis so each projection is ONE MXU matmul
    # (better sublane fill than Bt separate 16/8-row matmuls).
    x2d = x_ref[...].reshape(bt * n, in_dim)
    kp2d = kp_ref[...].reshape(bt * m, in_dim)

    q = (jnp.dot(x2d, wq_ref[...], preferred_element_type=jnp.float32)
         + bq_ref[...]).reshape(bt, n, d)
    kv = jnp.dot(kp2d, wkv_ref[...],
                 preferred_element_type=jnp.float32) + bkv_ref[...]
    k = kv[:, :d].reshape(bt, m, d)
    v = kv[:, d:].reshape(bt, m, d)

    # attention_scores = softmax(q @ k^T, dim=-1); batched contraction over the
    # feature axis (no materialized k.T).
    s = jnp.einsum('bnd,bmd->bnm', q, k,
                   preferred_element_type=jnp.float32)          # (Bt, N, M)
    s = s - jnp.max(s, axis=-1, keepdims=True)                   # numerical safety
    p = jnp.exp(s)
    p = p / jnp.sum(p, axis=-1, keepdims=True)                   # exact divide

    # output = scores @ V, stored directly at width out_dim (no padding).
    o = jnp.einsum('bnm,bmd->bnd', p, v, preferred_element_type=jnp.float32)
    o_ref[...] = o.astype(o_ref.dtype)


def pack_self_attention_params(wq, bq, wk, bk, wv, bv):
    """One-time packing, hoisted out of the per-call hot path.

    wq/wk/wv: (in_dim, out_dim)  (already transposed from torch's (out, in))
    bq/bk/bv: (out_dim,)
    Returns (wq, bq_2d, wkv, bkv_2d) with K/V fused for a single projection matmul.
    """
    wkv = jnp.concatenate([wk, wv], axis=1)            # (in_dim, 2*out_dim)
    bkv = jnp.concatenate([bk, bv], axis=0)[None, :]   # (1, 2*out_dim)
    return wq, bq[None, :], wkv, bkv


def self_attention(x, kernal_point, packed_params):
    """Pallas SelfAttention forward.

    x:            (N, in_dim) or (B, N, in_dim)
    kernal_point: (M, in_dim) or (B, M, in_dim)
    packed_params: result of pack_self_attention_params(...)
    Returns (N, out_dim) or (B, N, out_dim), float32.
    """
    wq, bq2d, wkv, bkv2d = packed_params

    squeeze_batch = (x.ndim == 2)
    if squeeze_batch:
        x = x[None]
        kernal_point = kernal_point[None]

    B, N, in_dim = x.shape
    _, M, _ = kernal_point.shape
    out_dim = wq.shape[1]

    # At most 2 grid steps: one per TensorCore on v7x (parallel semantics);
    # on single-TC v5e/v6e this just minimizes per-step pipeline overhead.
    grid_b = 2 if (B >= 2 and B % 2 == 0) else 1
    bt = B // grid_b

    out = pl.pallas_call(
        _self_attention_kernel,
        out_shape=jax.ShapeDtypeStruct((B, N, out_dim), jnp.float32),
        grid_spec=pltpu.PrefetchScalarGridSpec(
            num_scalar_prefetch=0,
            grid=(grid_b,),
            in_specs=[
                pl.BlockSpec((bt, N, in_dim), lambda b: (b, 0, 0)),     # x
                pl.BlockSpec((bt, M, in_dim), lambda b: (b, 0, 0)),     # kernal_point
                pl.BlockSpec((in_dim, out_dim), lambda b: (0, 0)),      # Wq  (resident)
                pl.BlockSpec((1, out_dim), lambda b: (0, 0)),           # bq  (resident)
                pl.BlockSpec((in_dim, 2 * out_dim), lambda b: (0, 0)),  # Wkv (resident)
                pl.BlockSpec((1, 2 * out_dim), lambda b: (0, 0)),       # bkv (resident)
            ],
            out_specs=pl.BlockSpec((bt, N, out_dim), lambda b: (b, 0, 0)),
        ),
        compiler_params=pltpu.CompilerParams(
            dimension_semantics=("parallel",)),                  # shards across v7x TCs
    )(x, kernal_point, wq, bq2d, wkv, bkv2d)

    if squeeze_batch:
        out = out[0]
    return out


def _init_linear_params(key, in_dim, out_dim):
    """Deterministic init mimicking torch.nn.Linear default (uniform ±1/sqrt(in))."""
    kw, kb = jax.random.split(key)
    bound = 1.0 / jnp.sqrt(jnp.float32(in_dim))
    # torch weight is (out_dim, in_dim); we store its transpose (in_dim, out_dim).
    w = jax.random.uniform(kw, (in_dim, out_dim), jnp.float32, -bound, bound)
    b = jax.random.uniform(kb, (out_dim,), jnp.float32, -bound, bound)
    return w, b


if __name__ == "__main__":
    key = jax.random.PRNGKey(0)
    k_x, k_kp, k_q, k_k, k_v = jax.random.split(key, 5)

    B, N, M = 4, 16, 8       # batch of point clouds / points / kernel points
    in_dim, out_dim = 32, 32

    x = jax.random.normal(k_x, (B, N, in_dim), jnp.float32)
    kernal_point = jax.random.normal(k_kp, (B, M, in_dim), jnp.float32)

    wq, bq = _init_linear_params(k_q, in_dim, out_dim)
    wk, bk = _init_linear_params(k_k, in_dim, out_dim)
    wv, bv = _init_linear_params(k_v, in_dim, out_dim)

    # Packing is done ONCE, outside the per-call hot path.
    packed = pack_self_attention_params(wq, bq, wk, bk, wv, bv)

    # Batched kernel call.
    out = self_attention(x, kernal_point, packed)
    out = jax.block_until_ready(out)

    # Pure-JAX reference (same math as the PyTorch module).
    def ref_fn(xb, kpb):
        q = xb @ wq + bq
        k = kpb @ wk + bk
        v = kpb @ wv + bv
        p = jax.nn.softmax(q @ k.T, axis=-1)
        return p @ v

    ref = jax.vmap(ref_fn)(x, kernal_point)
    assert out.shape == (B, N, out_dim)
    assert jnp.allclose(out, ref, atol=1e-4, rtol=1e-4), "batched mismatch vs reference"

    # Unbatched path (exactly the module's forward signature).
    out1 = self_attention(x[0], kernal_point[0], packed)
    out1 = jax.block_until_ready(out1)
    assert out1.shape == (N, out_dim)
    assert jnp.allclose(out1, ref_fn(x[0], kernal_point[0]), atol=1e-4, rtol=1e-4), \
        "unbatched mismatch vs reference"

    print("KERNEL_OK")
</pallas_src>

<mosaic_0001>
module attributes {stable_mosaic.version = 11 : i64} {
  func.func @_self_attention_kernel(%arg0: i32, %arg1: memref<2x16x32xf32, #tpu.memory_space<vmem>>, %arg2: memref<2x8x32xf32, #tpu.memory_space<vmem>>, %arg3: memref<32x32xf32, #tpu.memory_space<vmem>>, %arg4: memref<1x32xf32, #tpu.memory_space<vmem>>, %arg5: memref<32x64xf32, #tpu.memory_space<vmem>>, %arg6: memref<1x64xf32, #tpu.memory_space<vmem>>, %arg7: memref<2x16x32xf32, #tpu.memory_space<vmem>>) attributes {dimension_semantics = [#tpu.dimension_semantics<parallel>], iteration_bounds = array<i64: 2>, scalar_prefetch = 0 : i64, scratch_operands = 0 : i64, tpu.core_type = #tpu.core_type<tc>, window_params = [{transform_indices = @transform_0, window_bounds = array<i64: 2, 16, 32>}, {transform_indices = @transform_1, window_bounds = array<i64: 2, 8, 32>}, {pipeline_mode = #tpu.pipeline_mode<synchronous>, transform_indices = @transform_2, window_bounds = array<i64: 32, 32>}, {pipeline_mode = #tpu.pipeline_mode<synchronous>, transform_indices = @transform_3, window_bounds = array<i64: 1, 32>}, {pipeline_mode = #tpu.pipeline_mode<synchronous>, transform_indices = @transform_4, window_bounds = array<i64: 32, 64>}, {pipeline_mode = #tpu.pipeline_mode<synchronous>, transform_indices = @transform_5, window_bounds = array<i64: 1, 64>}, {transform_indices = @transform_6, window_bounds = array<i64: 2, 16, 32>}]} {
    %c0 = arith.constant 0 : index
    %c0_0 = arith.constant 0 : index
    %c0_1 = arith.constant 0 : index
    %0 = vector.load %arg1[%c0, %c0_0, %c0_1] : memref<2x16x32xf32, #tpu.memory_space<vmem>>, vector<2x16x32xf32>
    %1 = vector.shape_cast %0 : vector<2x16x32xf32> to vector<32x32xf32>
    %c0_2 = arith.constant 0 : index
    %c0_3 = arith.constant 0 : index
    %c0_4 = arith.constant 0 : index
    %2 = vector.load %arg2[%c0_2, %c0_3, %c0_4] : memref<2x8x32xf32, #tpu.memory_space<vmem>>, vector<2x8x32xf32>
    %3 = vector.shape_cast %2 : vector<2x8x32xf32> to vector<16x32xf32>
    %c0_5 = arith.constant 0 : index
    %c0_6 = arith.constant 0 : index
    %4 = vector.load %arg3[%c0_5, %c0_6] : memref<32x32xf32, #tpu.memory_space<vmem>>, vector<32x32xf32>
    %cst = arith.constant dense<0.000000e+00> : vector<32x32xf32>
    %5 = tpu.matmul %1, %4, %cst {dimension_numbers = #tpu.dot_dimension_numbers<[1], [0], [0], [1], [0, 0, 1, 1], [], []>} : vector<32x32xf32>, vector<32x32xf32>, vector<32x32xf32> -> vector<32x32xf32>
    %c0_7 = arith.constant 0 : index
    %c0_8 = arith.constant 0 : index
    %6 = vector.load %arg4[%c0_7, %c0_8] : memref<1x32xf32, #tpu.memory_space<vmem>>, vector<1x32xf32>
    %7 = vector.broadcast %6 : vector<1x32xf32> to vector<32x32xf32>
    %8 = arith.addf %5, %7 : vector<32x32xf32>
    %9 = vector.shape_cast %8 : vector<32x32xf32> to vector<2x16x32xf32>
    %c0_9 = arith.constant 0 : index
    %c0_10 = arith.constant 0 : index
    %10 = vector.load %arg5[%c0_9, %c0_10] : memref<32x64xf32, #tpu.memory_space<vmem>>, vector<32x64xf32>
    %cst_11 = arith.constant dense<0.000000e+00> : vector<16x64xf32>
    %11 = tpu.matmul %3, %10, %cst_11 {dimension_numbers = #tpu.dot_dimension_numbers<[1], [0], [0], [1], [0, 0, 1, 1], [], []>} : vector<16x32xf32>, vector<32x64xf32>, vector<16x64xf32> -> vector<16x64xf32>
    %c0_12 = arith.constant 0 : index
    %c0_13 = arith.constant 0 : index
    %12 = vector.load %arg6[%c0_12, %c0_13] : memref<1x64xf32, #tpu.memory_space<vmem>>, vector<1x64xf32>
    %13 = vector.broadcast %12 : vector<1x64xf32> to vector<16x64xf32>
    %14 = arith.addf %11, %13 : vector<16x64xf32>
    %15 = vector.extract_strided_slice %14 {offsets = [0, 0], sizes = [16, 32], strides = [1, 1]} : vector<16x64xf32> to vector<16x32xf32>
    %16 = vector.shape_cast %15 : vector<16x32xf32> to vector<2x8x32xf32>
    %17 = vector.extract_strided_slice %14 {offsets = [0, 32], sizes = [16, 32], strides = [1, 1]} : vector<16x64xf32> to vector<16x32xf32>
    %18 = vector.shape_cast %17 : vector<16x32xf32> to vector<2x8x32xf32>
    "tpu.trace_start"() <{level = 10 : i32, message = "bnd,bmd->bnm"}> : () -> ()
    %cst_14 = arith.constant dense<0.000000e+00> : vector<2x16x8xf32>
    %19 = tpu.matmul %9, %16, %cst_14 {dimension_numbers = #tpu.dot_dimension_numbers<[2], [2], [1], [1], [0, 0, 0, 1, 1, 1], [0], [0]>} : vector<2x16x32xf32>, vector<2x8x32xf32>, vector<2x16x8xf32> -> vector<2x16x8xf32>
    "tpu.trace_stop"() : () -> ()
    %cst_15 = arith.constant dense<0xFF800000> : vector<2x16xf32>
    %20 = vector.multi_reduction <maximumf>, %19, %cst_15 [2] : vector<2x16x8xf32> to vector<2x16xf32>
    %21 = vector.shape_cast %20 : vector<2x16xf32> to vector<2x16x1xf32>
    %22 = vector.broadcast %21 : vector<2x16x1xf32> to vector<2x16x8xf32>
    %23 = arith.subf %19, %22 : vector<2x16x8xf32>
    %24 = math.exp %23 : vector<2x16x8xf32>
    %cst_16 = arith.constant dense<0.000000e+00> : vector<2x16xf32>
    %25 = vector.multi_reduction <add>, %24, %cst_16 [2] : vector<2x16x8xf32> to vector<2x16xf32>
    %26 = vector.shape_cast %25 : vector<2x16xf32> to vector<2x16x1xf32>
    %27 = vector.broadcast %26 : vector<2x16x1xf32> to vector<2x16x8xf32>
    %28 = arith.divf %24, %27 : vector<2x16x8xf32>
    "tpu.trace_start"() <{level = 10 : i32, message = "bnm,bmd->bnd"}> : () -> ()
    %cst_17 = arith.constant dense<0.000000e+00> : vector<2x16x32xf32>
    %29 = tpu.matmul %28, %18, %cst_17 {dimension_numbers = #tpu.dot_dimension_numbers<[2], [1], [1], [2], [0, 0, 0, 1, 1, 2], [0], [0]>} : vector<2x16x8xf32>, vector<2x8x32xf32>, vector<2x16x32xf32> -> vector<2x16x32xf32>
    "tpu.trace_stop"() : () -> ()
    %c0_18 = arith.constant 0 : index
    %c0_19 = arith.constant 0 : index
    %c0_20 = arith.constant 0 : index
    %30 = vector.load %arg7[%c0_18, %c0_19, %c0_20] : memref<2x16x32xf32, #tpu.memory_space<vmem>>, vector<2x16x32xf32>
    tpu.vector_store %arg7[%c0_18, %c0_19, %c0_20], %29 {strides = array<i32>} : memref<2x16x32xf32, #tpu.memory_space<vmem>>, vector<2x16x32xf32>,
    return
  }
  func.func @transform_0(%arg0: i32) -> (i32, i32, i32) {
    %c0_i32 = arith.constant 0 : i32
    %c0_i32_0 = arith.constant 0 : i32
    %c0_i32_1 = arith.constant 0 : i32
    return %arg0, %c0_i32, %c0_i32_0 : i32, i32, i32
  }
  func.func @transform_1(%arg0: i32) -> (i32, i32, i32) {
    %c0_i32 = arith.constant 0 : i32
    %c0_i32_0 = arith.constant 0 : i32
    %c0_i32_1 = arith.constant 0 : i32
    return %arg0, %c0_i32, %c0_i32_0 : i32, i32, i32
  }
  func.func @transform_2(%arg0: i32) -> (i32, i32) {
    %c0_i32 = arith.constant 0 : i32
    %c0_i32_0 = arith.constant 0 : i32
    %c0_i32_1 = arith.constant 0 : i32
    return %c0_i32, %c0_i32_0 : i32, i32
  }
  func.func @transform_3(%arg0: i32) -> (i32, i32) {
    %c0_i32 = arith.constant 0 : i32
    %c0_i32_0 = arith.constant 0 : i32
    %c0_i32_1 = arith.constant 0 : i32
    return %c0_i32, %c0_i32_0 : i32, i32
  }
  func.func @transform_4(%arg0: i32) -> (i32, i32) {
    %c0_i32 = arith.constant 0 : i32
    %c0_i32_0 = arith.constant 0 : i32
    %c0_i32_1 = arith.constant 0 : i32
    return %c0_i32, %c0_i32_0 : i32, i32
  }
  func.func @transform_5(%arg0: i32) -> (i32, i32) {
    %c0_i32 = arith.constant 0 : i32
    %c0_i32_0 = arith.constant 0 : i32
    %c0_i32_1 = arith.constant 0 : i32
    return %c0_i32, %c0_i32_0 : i32, i32
  }
  func.func @transform_6(%arg0: i32) -> (i32, i32, i32) {
    %c0_i32 = arith.constant 0 : i32
    %c0_i32_0 = arith.constant 0 : i32
    %c0_i32_1 = arith.constant 0 : i32
    return %arg0, %c0_i32, %c0_i32_0 : i32, i32, i32
  }
}

</mosaic_0001>

<bundles_post_ra>
// kernel: tpu_custom_call.1
= control target key start
LH: loop header
LB: loop body
LE: loop exit
PB: predicated region body
PF: predicated region fallthrough
CT: control target
= control target key end

     0   :  { %s1882_s0 = inlined_call_operand.hbm [shape: f32[4,16,32], index: 0, kind: input, shape index: {}]   ;;  %s1883_s1 = inlined_call_operand.hbm [shape: f32[4,8,32], index: 1, kind: input, shape index: {}]   ;;  %s1884_s2 = inlined_call_operand.hbm [shape: f32[32,32], index: 2, kind: input, shape index: {}]   ;;  %s1885_s3 = inlined_call_operand.vmem [shape: f32[1,32], index: 3, kind: input, shape index: {}]   ;;  %s1886_s4 = inlined_call_operand.hbm [shape: f32[32,64], index: 4, kind: input, shape index: {}]   ;;  %s1887_s5 = inlined_call_operand.vmem [shape: f32[1,64], index: 5, kind: input, shape index: {}]   ;;  %s1888_s6 = inlined_call_operand.hbm [shape: f32[4,16,32], index: 6, kind: output, shape index: {}]  }
   0x1   :  { %1896 = sst [smem:[#allocation17_spill]] %s1882_s0 }
   0x2   :  { %1897 = sst [smem:[#allocation18_spill]] %s1884_s2 }
   0x3   :  { %1898 = sst [smem:[#allocation19_spill]] %s1886_s4 }
   0x4   :  { %11 = vsyncpa [#allocation3], 0 }
   0x5   :  { %13 = vsyncpa [#allocation3 + $0x1], 0 }
   0x6   :  { %14 = vsyncpa [#allocation6], 0 }
   0x7   :  { %16 = vsyncpa [#allocation6 + $0x1], 0 }
   0x8   :  { %17 = vsyncpa [#allocation9], 0 }
   0x9   :  { %18 = vsyncpa [#allocation4], 0 }
   0xa   :  { %20 = vsyncpa [#allocation4 + $0x1], 0  ;;  %s1533_s21 = smov 0   ;;  %s1535_s22 = smov 0  }
   0xb   :  { %s1537_s23 = smov 0   ;;  %s1539_s24 = smov 0  }
   0xc LB: > { %s1554_s25 = sadd.s32 4294967295, %s1486_s24   ;;  %s1065_s26 = sadd.s32 4294967294, %s1486_s24   ;;  %s1486_s24 = sphi %s1539_s24, %s1925_s24   ;;  %s1482_s23 = sphi %s1537_s23, %s1924_s23   ;;  %s1478_s22 = sphi %s1535_s22, %s1923_s22   ;;  %s1474_s21 = sphi %s1533_s21, %s1922_s21  }
   0xd   : > { %p46_p0 = scmp.ne.s32.totalorder %s1478_s22, %s1474_s21  ;;  %p1889_p1 = scmp.eq.s32.totalorder %s1554_s25, 0 }
   0xe   : > { %p186_p3 = scmp.eq.s32.totalorder %s1065_s26, 1  ;;  %p1066_p5 = scmp.ge.s32.totalorder %s1486_s24, 1 }
   0xf   : > { %p1563_p4 = por %p1889_p1, %p46_p0  ;;  %p193_p7 = scmp.lt.s32.totalorder %s1486_s24, 3 }
  0x10   : > { %p1568_p6 = por %p186_p3, %p46_p0  ;;  %s1488_s30 = smov [#allocation7]  }
  0x11   : > { %s1899_s27 = scalar_select %p1563_p4, 1, 0 }
  0x12   : > { %s1900_s28 = scalar_select %p1568_p6, 1, 0 }
  0x13   : > { %p1573_p8 = pnand %p1066_p5, %p193_p7  ;;  %s205_s7 = sshll.u32 %s1488_s30, 4  ;;  %s1577_s7 = int_to_ptr.vmem [resolvable:$true] %s205_s7 }
  0x14   : > { %s1489_s9 = smov [#allocation8]   ;;  %s1903_s2 = sld [smem:[#allocation18_spill]] }
  0x15   : > { %p1213_p9 = pneg %p1573_p8  ;;  %s221_s10 = sshll.u32 %s1489_s9, 4  ;;  %s1588_s10 = int_to_ptr.vmem [resolvable:$true] %s221_s10 }
  0x17   : > { %p1584_p11 = pnand %p1213_p9, %p1889_p1 }
  0x19   : > { %p1294_p13 = pneg %p1584_p11 }
  0x1a   : > { %s1292_s13 = scalar_lea.hbm %s1903_s2, 512 }
  0x1b   : > { %p1293_p12 = scmp.ne.s32.totalorder %s1903_s2, %s1292_s13  ;;  %p1299_p5 = scmp.lt.u32.totalorder %s1292_s13, %s1903_s2 }
  0x1d   : > { %p1295_p0 = pnand %p1294_p13, %p1293_p12 }
  0x1f   : > { %p1296_p3 = pneg %p1295_p0 }
  0x21   : > { %p1301_p7 = pnand %p1299_p5, %p1296_p3 }
  0x23   : > { %1304 = shalt.err (!%p1301_p7)
}
  0x24   : > { %s1305_s18 = scalar_lea.vmem %s1577_s7, 512  ;;  %p1313_p2 = scmp.lt.s32.totalorder %s1577_s7, %s1577_s7 }
  0x25   : > { %p1306_p9 = scmp.ne.s32.totalorder %s1577_s7, %s1305_s18  ;;  %p1314_p12 = scmp.lt.s32.totalorder %s1305_s18, %s1305_s18 }
  0x27   : > { %p1308_p10 = pnand %p1306_p9, %p1294_p13  ;;  %p1315_p0 = por %p1314_p12, %p1313_p2 }
  0x29   : > { %p1309_p1 = pneg %p1308_p10 }
  0x2b   : > { %p1316_p6 = pnand %p1315_p0, %p1309_p1 }
  0x2d   : > { %1319 = shalt.err (!%p1316_p6)
}
  0x2e   : > { %s1890_s19 = smov 128   ;;  %s1892_s20 = smov 8  }
  0x2f   : > { %1216 = dma.hbm_to_vmem [thread:$0]  (!%p1584_p11), %s1903_s2, 512, %s1577_s7, [#allocation6], %s1890_s19, %s1890_s19, %s1892_s20  }
  0x30   : > { %s1904_s4 = sld [smem:[#allocation19_spill]] }
  0x36   : > { %s1320_s12 = scalar_lea.hbm %s1904_s4, 512 }
  0x37   : > { %p1321_p1 = scmp.ne.s32.totalorder %s1904_s4, %s1320_s12  ;;  %p1327_p10 = scmp.lt.u32.totalorder %s1320_s12, %s1904_s4 }
  0x39   : > { %p1323_p2 = pnand %p1321_p1, %p1294_p13 }
  0x3b   : > { %p1324_p6 = pneg %p1323_p2 }
  0x3d   : > { %p1329_p3 = pnand %p1327_p10, %p1324_p6 }
  0x3f   : > { %1332 = shalt.err (!%p1329_p3)
}
  0x40   : > { %s1333_s7 = scalar_lea.vmem %s1588_s10, 512  ;;  %p1341_p12 = scmp.lt.s32.totalorder %s1588_s10, %s1588_s10 }
  0x41   : > { %p1334_p5 = scmp.ne.s32.totalorder %s1588_s10, %s1333_s7  ;;  %p1342_p0 = scmp.lt.s32.totalorder %s1333_s7, %s1333_s7 }
  0x43   : > { %p1336_p7 = pnand %p1334_p5, %p1294_p13  ;;  %p1343_p1 = por %p1342_p0, %p1341_p12 }
  0x45   : > { %p1337_p9 = pneg %p1336_p7 }
  0x47   : > { %p1344_p2 = pnand %p1343_p1, %p1337_p9 }
  0x49   : > { %1347 = shalt.err (!%p1344_p2)
}
  0x4a   : > { %1219 = dma.hbm_to_vmem [thread:$0]  (!%p1584_p11), %s1904_s4, 512, %s1588_s10, [#allocation9], %s1890_s19, %s1890_s19, %s1892_s20  }
  0x4b   : > { %s1649_s8 = sadd.s32 1, %s1486_s24   ;;  %s33_s26 = sadd.s32 1, %s1482_s23 }
  0x4c   : > { %s30_s30 = ssub.s32 %s1486_s24, %s1649_s8  ;;  %p40_p13 = scmp.ne.s32.totalorder %s1482_s23, %s1478_s22 }
  0x4d   : > { %p31_p6 = scmp.eq.s32.totalorder %s30_s30, 0  ;;  %p41_p10 = scmp.eq.s32.totalorder %s1486_s24, 0 }
  0x4e   : > { %p1905_p3 = scmp.eq.s32.totalorder %s1554_s25, 1  ;;  %p1233_p7 = scmp.lt.s32.totalorder %s1486_s24, 2 }
  0x4f   : > { %s1665_s11 = scalar_select %p31_p6, %s1482_s23, %s33_s26  }
  0x50   : > { %p1659_p5 = por %p1905_p3, %p40_p13  ;;  %p42_p9 = por %p41_p10, %p40_p13 }
  0x51   : > { %1907 = sst [smem:[#allocation16_spill]] %s1665_s11  ;;  %s1668_s12 = sand.u32 1, %s1482_s23  }
  0x52   : > { %s1906_s9 = scalar_select %p1659_p5, 1, 0 }
  0x53   : > { %s1070_s10 = sshll.u32 %s1668_s12, 5  ;;  %s1108_s13 = sshll.u32 %s1486_s24, 9 }
  0x54   : > { %s1908_s0 = sld [smem:[#allocation17_spill]]  ;;  %s242_s7 = scalar_lea.vmem [#allocation2], %s1070_s10 }
  0x55   : > { %s250_s17 = sshll.u32 %s242_s7, 4  ;;  %p1679_p11 = pnand %p1233_p7, %p42_p9  ;;  %s1677_s17 = int_to_ptr.vmem [resolvable:$true] %s250_s17 }
  0x56   : > { %s1074_s30 = sshll.u32 %s1668_s12, 4  ;;  %s239_s19 = scalar_lea.sflag [#allocation3], %s1668_s12 }
  0x57   : > { %p1350_p0 = pneg %p1679_p11 }
  0x5a   : > { %s1675_s16 = scalar_lea.hbm %s1908_s0, %s1108_s13  ;;  %s1353_s15 = scalar_lea.hbm %s1908_s0, 1024 }
  0x5b   : > { %s1348_s14 = scalar_lea.hbm %s1675_s16, 512  ;;  %p1354_p13 = scmp.lt.u32.totalorder %s1675_s16, %s1908_s0 }
  0x5c   : > { %p1349_p12 = scmp.ne.s32.totalorder %s1675_s16, %s1348_s14  ;;  %p1355_p6 = scmp.lt.u32.totalorder %s1353_s15, %s1348_s14 }
  0x5d   : > { %p1357_p3 = scmp.lt.u32.totalorder %s1348_s14, %s1675_s16 }
  0x5e   : > { %p1351_p1 = pnand %p1350_p0, %p1349_p12  ;;  %p1356_p10 = por %p1355_p6, %p1354_p13 }
  0x60   : > { %p1352_p2 = pneg %p1351_p1  ;;  %p1358_p7 = por %p1357_p3, %p1356_p10 }
  0x62   : > { %p1359_p9 = pnand %p1358_p7, %p1352_p2 }
  0x64   : > { %1362 = shalt.err (!%p1359_p9)
}
  0x65   : > { %s1363_s26 = scalar_lea.vmem %s1677_s17, 512  ;;  %s1492_s10 = smov [#allocation2]  }
  0x66   : > { %p1364_p12 = scmp.ne.s32.totalorder %s1677_s17, %s1363_s26  ;;  %s1368_s13 = sshll.u32 %s1492_s10, 4  ;;  %s1369_s13 = int_to_ptr.vmem [resolvable:$false] %s1368_s13 }
  0x67   : > { %s1370_s20 = scalar_lea.vmem %s1369_s13, 1024  ;;  %p1371_p4 = scmp.lt.s32.totalorder %s1677_s17, %s1369_s13 }
  0x68   : > { %p1366_p1 = pnand %p1364_p12, %p1350_p0  ;;  %p1372_p13 = scmp.lt.s32.totalorder %s1370_s20, %s1363_s26 }
  0x6a   : > { %p1367_p5 = pneg %p1366_p1  ;;  %p1373_p6 = por %p1372_p13, %p1371_p4 }
  0x6c   : > { %p1374_p10 = pnand %p1373_p6, %p1367_p5 }
  0x6e   : > { %1377 = shalt.err (!%p1374_p10)
}
  0x6f   : > { %s1910_s14 = smov 8   ;;  %s1911_s15 = smov 128  }
  0x70   : > { %1223 = dma.hbm_to_vmem [thread:$0]  (!%p1679_p11), %s1675_s16, 512, %s1677_s17, %s239_s19, %s1911_s15, %s1911_s15, %s1910_s14  }
  0x71   : > { %s1109_s7 = sshll.u32 %s1486_s24, 8  ;;  %s264_s20 = scalar_lea.vmem [#allocation5], %s1074_s30 }
  0x72   : > { %s1720_s13 = scalar_lea.hbm %s1883_s1, %s1109_s7  ;;  %s271_s0 = sshll.u32 %s264_s20, 4  ;;  %s1724_s0 = int_to_ptr.vmem [resolvable:$true] %s271_s0 }
  0x73   : > { %s1912_s2 = sand.u32 1, %s1486_s24   ;;  %s1378_s11 = scalar_lea.hbm %s1720_s13, 256 }
  0x74   : > { %s1728_s4 = scalar_lea.sflag [#allocation6], %s1912_s2  ;;  %p1379_p4 = scmp.ne.s32.totalorder %s1720_s13, %s1378_s11 }
  0x75   : > { %s1383_s12 = scalar_lea.hbm %s1883_s1, 512  ;;  %p1384_p3 = scmp.lt.u32.totalorder %s1720_s13, %s1883_s1 }
  0x76   : > { %p1381_p5 = pnand %p1379_p4, %p1350_p0  ;;  %p1385_p7 = scmp.lt.u32.totalorder %s1383_s12, %s1378_s11 }
  0x77   : > { %p1387_p12 = scmp.lt.u32.totalorder %s1378_s11, %s1720_s13 }
  0x78   : > { %p1382_p2 = pneg %p1381_p5  ;;  %p1386_p9 = por %p1385_p7, %p1384_p3 }
  0x7a   : > { %p1388_p1 = por %p1387_p12, %p1386_p9 }
  0x7c   : > { %p1389_p13 = pnand %p1388_p1, %p1382_p2 }
  0x7e   : > { %1392 = shalt.err (!%p1389_p13)
}
  0x7f   : > { %s1393_s2 = scalar_lea.vmem %s1724_s0, 256  ;;  %s1493_s30 = smov [#allocation5]  }
  0x80   : > { %p1394_p6 = scmp.ne.s32.totalorder %s1724_s0, %s1393_s2  ;;  %s1398_s10 = sshll.u32 %s1493_s30, 4  ;;  %s1399_s10 = int_to_ptr.vmem [resolvable:$false] %s1398_s10 }
  0x81   : > { %s1400_s26 = scalar_lea.vmem %s1399_s10, 512  ;;  %p1401_p5 = scmp.lt.s32.totalorder %s1724_s0, %s1399_s10 }
  0x82   : > { %p1396_p10 = pnand %p1394_p6, %p1350_p0  ;;  %p1402_p3 = scmp.lt.s32.totalorder %s1400_s26, %s1393_s2 }
  0x84   : > { %p1397_p4 = pneg %p1396_p10  ;;  %p1403_p7 = por %p1402_p3, %p1401_p5 }
  0x86   : > { %p1404_p9 = pnand %p1403_p7, %p1397_p4 }
  0x88   : > { %1407 = shalt.err (!%p1404_p9)
}
  0x89   : > { %1226 = dma.hbm_to_vmem [thread:$0]  (!%p1679_p11), %s1720_s13, 256, %s1724_s0, %s1728_s4, %s1911_s15, %s1911_s15, %s1910_s14  }
  0x8a   : > { %283 = sbr.rel (%p1573_p8) target bundleno = 1149 (0x47d), region = 44  ;;  %s1760_s11 = sand.u32 (!%p1573_p8), 1, %s1478_s22  }
  0x8b   : > { %s1078_s20 = sshll.u32 (!%p1573_p8), %s1760_s11, 5  ;;  %s286_s19 = scalar_lea.sflag (!%p1573_p8), [#allocation3], %s1760_s11 }
  0x8c   : > { %s1766_s18 = scalar_lea.vmem (!%p1573_p8), [#allocation2], %s1078_s20  ;;  %p1913_p0 = scmp.ne.s32.totalorder (!%p1573_p8), %s1899_s27, 0 }
  0x91   : > { %1453 = dma.done.wait (%p1913_p0), %s286_s19, 512  }
  0x92   : > { %1455 = vsyncadd (%p1913_p0), %s286_s19, 4294966784  ;;  %s294_s0 = sand.u32 1, %s1554_s25   ;;  %s1079_s4 = sshll.u32 %s1760_s11, 4 }
  0x93   : > { %s295_s29 = scalar_lea.sflag [#allocation6], %s294_s0  ;;  %s1774_s14 = scalar_lea.vmem [#allocation5], %s1079_s4 }
  0x94   : > { %1457 = dma.done.wait (%p1913_p0), %s295_s29, 256  }
  0x95   : > { %1459 = vsyncadd (%p1913_p0), %s295_s29, 4294967040  ;;  %p1914_p8 = scmp.eq.s32.totalorder %s1554_s25, 0 }
  0x97   : > { %1461 = dma.done.wait (%p1914_p8), [#allocation6], 512   ;;  %p1915_p11 = pmov %p1914_p8 }
  0x98   : > { %p1916_p2 = pmov %p1914_p8 }
  0x99   : > { %1463 = vsyncadd (%p1915_p11), [#allocation6], 4294966784 }
  0x9a   : > { %1465 = dma.done.wait (%p1916_p2), [#allocation9], 512   ;;  %p1917_p12 = pmov %p1916_p2 }
  0x9b   : > { %v458_v0 = vld [vmem:[#allocation8] sm:$0xff]  ;;  %v459_v1 = vld [vmem:[#allocation8 + $0x8] sm:$0xff]  ;;  %vm360_vm0 = vcmask 261120   ;;  %v460_v5 = vld [vmem:[#allocation8 + $0x10] sm:$0xff]  ;;  %vm718_vm1 = vcmask 64512   ;;  %s1494_s12 = smov 96  }
  0x9c   : > { %1467 = vsyncadd (%p1917_p12), [#allocation9], 4294966784  ;;  %v349_v2 = vld [vmem:[#allocation7] sm:$0xff]  ;;  %v1191_v3 = vpack.c.bf16 %v459_v1, %v458_v0  ;;  %v350_v4 = vld [vmem:[#allocation7 + $0x8] sm:$0xff]  ;;  %s339_s17 = scalar_lea.vmem [#allocation10], %s1078_s20  ;;  %s1111_s2 = sshll.u32 %s1554_s25, 9 }
  0x9d   : > { %v461_v6 = vld [vmem:[#allocation8 + $0x18] sm:$0xff]  ;;  %v1183_v7 = vpack.c.bf16 %v350_v4, %v349_v2  ;;  %v351_v9 = vld [vmem:[#allocation7 + $0x10] sm:$0xff]  ;;  %v343_v13 = vld [vmem:[%s1766_s18] sm:$0xff]  ;;  %s950_s7 = sshll.u32 %s339_s17, 4  ;;  %s1836_s26 = scalar_lea.hbm %s1888_s6, %s1111_s2  ;;  %s1830_s7 = int_to_ptr.vmem [resolvable:$true] %s950_s7 }
  0x9e   : > { %v1195_v8 = vpack.c.bf16 %v461_v6, %v460_v5  ;;  %v352_v10 = vld [vmem:[#allocation7 + $0x18] sm:$0xff]  ;;  %v347_v11 = vld [vmem:[%s1774_s14] sm:$0xff]  ;;  %1192 = vmatprep.subr.bf16.mxu1 %v1191_v3  ;;  %1146 = vmatprep.mubr.msk.f32.mxu0 %vm360_vm0, %v343_v13  ;;  %v344_v15 = vld [vmem:[%s1766_s18 + $0x8] sm:$0xff]  ;;  %s936_s25 = scalar_lea.sflag [#allocation4], %s1760_s11  ;;  %s1408_s20 = scalar_lea.vmem %s1830_s7, 512 }
  0x9f   : > { %v1187_v12 = vpack.c.bf16 %v352_v10, %v351_v9  ;;  %1160 = vmatprep.mubr.msk.f32.mxu1 %vm360_vm0, %v347_v11  ;;  %1184 = vmatprep.subr.bf16.mxu0 %v1183_v7  ;;  %v348_v14 = vld [vmem:[%s1774_s14 + $0x8] sm:$0xff]  ;;  %v345_v16 = vld [vmem:[%s1766_s18 + $0x10] sm:$0xff]  ;;  %v1088_v18 = vld [vmem:[%s1887_s5] ss:$0 sm:$0xff]  ;;  %p1409_p1 = scmp.ne.s32.totalorder %s1830_s7, %s1408_s20  ;;  %p1918_p13 = scmp.ne.s32.totalorder %s1906_s9, 0 }
  0xa0   : > { %1194 = vmatpush3.bf16.msra.mxu1 %v1191_v3  ;;  %1186 = vmatpush3.bf16.msra.mxu0 %v1183_v7  ;;  %v346_v17 = vld [vmem:[%s1766_s18 + $0x18] sm:$0xff]  ;;  %v1083_v20 = vld [vmem:[%s1885_s3] ss:$0 sm:$0xff]  ;;  %s1495_s19 = smov [#allocation10]  }
  0xa1   : > { %1196 = vmatprep.subr.bf16.mxu1 %v1195_v8  ;;  %1188 = vmatprep.subr.bf16.mxu0 %v1187_v12  ;;  %p1410_p6 = pnand %p1409_p1, %p1918_p13  ;;  %s1412_s18 = sshll.u32 %s1495_s19, 4  ;;  %s1413_s18 = int_to_ptr.vmem [resolvable:$false] %s1412_s18 }
  0xa2   : > { %s1414_s0 = scalar_lea.vmem %s1413_s18, 1024  ;;  %p1415_p4 = scmp.lt.s32.totalorder %s1830_s7, %s1413_s18 }
  0xa3   : > { %p1411_p10 = pneg %p1410_p6  ;;  %p1416_p5 = scmp.lt.s32.totalorder %s1414_s0, %s1408_s20 }
  0xa4   : > { %1198 = vmatpush3.bf16.msra.mxu1 %v1195_v8  ;;  %1190 = vmatpush3.bf16.msra.mxu0 %v1187_v12 }
  0xa5   : > { %p1417_p3 = por %p1416_p5, %p1415_p4 }
  0xa7   : > { %1161 = vmatmul.mubr.msk.f32.vlgmr.msra.gmra.mrb[0].mxu1 %vm360_vm0, %v348_v14  ;;  %1147 = vmatmul.mubr.msk.f32.vlgmr.msra.gmra.mrb[0].mxu0 %vm360_vm0, %v344_v15  ;;  %p1418_p7 = pnand %p1417_p3, %p1411_p10 }
  0xa8   : > { %1149 = vmatprep.mubr.msk.f32.mxu0 %vm360_vm0, %v345_v16 }
  0xab   : > { %1150 = vmatmul.mubr.msk.f32.gmra.mrb[2].mxu0 %vm360_vm0, %v346_v17 }
 0x17a   : > { %v1162_v19 = vpop.f32.mrb[0].mxu1  ;;  %v1148_v23 = vpop.f32.mrb[0].mxu0 }
 0x17b   : > { %v547_v21 = vadd.f32 %v1162_v19, %v1088_v18  ;;  %v541_v22 = vpop.f32.mrb[1].mxu1  ;;  %v439_v25 = vpop.f32.mrb[1].mxu0  ;;  %v445_v28 = vadd.f32 %v1148_v23, %v1083_v20 }
 0x17c   : > { %v542_v24 = vadd.f32 %v1088_v18, %v541_v22  ;;  %v440_v26 = vadd.f32 %v1083_v20, %v439_v25 }
 0x17d   : > { %1168 = vmatprep.subr.msk.mxu0 %vm360_vm0, %v547_v21 }
 0x17e   : > { %1163 = vmatprep.subr.msk.mxu1 %vm360_vm0, %v542_v24  ;;  %1169 = vmatpush3.xpose.msk.msra.mxu0 %vm360_vm0, %v547_v21  ;;  %v1151_v27 = vpop.f32.mrb[2].mxu0 }
 0x17f   : > { %1164 = vmatpush3.xpose.msk.msra.mxu1 %vm360_vm0, %v542_v24  ;;  %1165 = vmatprep.mubr.msk.f32.mxu1 %vm360_vm0, %v440_v26  ;;  %v455_v29 = vadd.f32 %v1151_v27, %v1083_v20  ;;  %v449_v30 = vpop.f32.mrb[3].mxu0 }
 0x180   : > { %v450_v31 = vadd.f32 %v1083_v20, %v449_v30 }
 0x182   : > { %1166 = vmatmul.mubr.msk.f32.vlgmr.msra.gmra.mrb[2].mxu1 %vm360_vm0, %v445_v28  ;;  %1170 = vmatprep.mubr.msk.f32.mxu0 %vm360_vm0, %v450_v31 }
 0x183   : > { %1171 = vmatmul.mubr.msk.f32.vlgmr.msra.gmra.mrb[4].mxu0 %vm360_vm0, %v455_v29 }
 0x255   : > { %v1167_v32 = vpop.f32.mrb[2].mxu1 }
 0x256   : > { %v625_v33 = vpop.f32.mrb[3].mxu1  ;;  %v722_v34 = vsel %vm718_vm1, %v1167_v32, -inf  ;;  %v1172_v35 = vpop.f32.mrb[4].mxu0 }
 0x257   : > { %723 = vmax.xlane.f32.xlu1 %v722_v34  ;;  %v719_v36 = vsel %vm718_vm1, %v625_v33, -inf  ;;  %v709_v37 = vpop.f32.mrb[5].mxu0  ;;  %v728_v38 = vsel %vm718_vm1, %v1172_v35, -inf }
 0x258   : > { %720 = vmax.xlane.f32.xlu0 %v719_v36  ;;  %v725_v39 = vsel %vm718_vm1, %v709_v37, -inf }
 0x25b   : > { %729 = vmax.xlane.f32.xlu1 %v728_v38 }
 0x25c   : > { %726 = vmax.xlane.f32.xlu0 %v725_v39 }
 0x2e4   : > { %v724_v40 = vpop.xlane.xlu1 %723 }
 0x2e5   : > { %v732_v41 = vsub.f32 %v1167_v32, %v724_v40  ;;  %v721_v42 = vpop.xlane.xlu0 %720 }
 0x2e6   : > { %v731_v43 = vsub.f32 %v625_v33, %v721_v42 }
 0x2e7   : > { %v737_v44 = vmul.f32 1.442695, %v732_v41 }
 0x2e8   : > { %v735_v45 = vmul.f32 1.442695, %v731_v43  ;;  %v730_v46 = vpop.xlane.xlu1 %729 }
 0x2e9   : > { %1276 = vpow2.f32 %v737_v44  ;;  %v734_v47 = vsub.f32 %v1172_v35, %v730_v46  ;;  %v727_v48 = vpop.xlane.xlu0 %726 }
 0x2ea   : > { %v733_v49 = vsub.f32 %v709_v37, %v727_v48  ;;  %1278 = vpow2.f32 %v735_v45 }
 0x2eb   : > { %v741_v50 = vmul.f32 1.442695, %v734_v47 }
 0x2ec   : > { %v739_v51 = vmul.f32 1.442695, %v733_v49 }
 0x2ed   : > { %1280 = vpow2.f32 %v741_v50 }
 0x2ee   : > { %1282 = vpow2.f32 %v739_v51 }
 0x2f3   : > { %v1277_v52 = vpop.eup %1276 }
 0x2f4   : > { %v746_v53 = vsel %vm718_vm1, %v1277_v52, 0.0  ;;  %v1279_v54 = vpop.eup %1278 }
 0x2f5   : > { %747 = vadd.xlane.f32.xlu0 %v746_v53  ;;  %v743_v57 = vsel %vm718_vm1, %v1279_v54, 0.0 }
 0x2f7   : > { %v1281_v55 = vpop.eup %1280 }
 0x2f8   : > { %v752_v56 = vsel %vm718_vm1, %v1281_v55, 0.0  ;;  %v1283_v58 = vpop.eup %1282 }
 0x2f9   : > { %753 = vadd.xlane.f32.xlu1 %v752_v56  ;;  %744 = vadd.xlane.f32.xlu0 %v743_v57  ;;  %v749_v59 = vsel %vm718_vm1, %v1283_v58, 0.0 }
 0x2fd   : > { %750 = vadd.xlane.f32.xlu1 %v749_v59 }
 0x30e   : > { %847 = vrot.lane.b32.xlu1 %v547_v21, %s1494_s12 }
 0x30f   : > { %763 = vrot.lane.b32.xlu0 %v542_v24, %s1494_s12 }
 0x382   : > { %v748_v60 = vpop.xlane.xlu0 %747 }
 0x383   : > { %1284 = vrcp.f32 %v748_v60 }
 0x386   : > { %v754_v61 = vpop.xlane.xlu1 %753  ;;  %v745_v62 = vpop.xlane.xlu0 %744 }
 0x387   : > { %1286 = vrcp.f32 %v745_v62 }
 0x388   : > { %1288 = vrcp.f32 %v754_v61 }
 0x38a   : > { %v751_v63 = vpop.xlane.xlu1 %750  ;;  %v764_v0 = vpop.permute.xlu0 %763 }
 0x38b   : > { %1290 = vrcp.f32 %v751_v63  ;;  %1173 = vmatprep.subr.mxu1 %v764_v0 }
 0x38c   : > { %1174 = vmatpush3.msra.mxu1 %v764_v0 }
 0x38d   : > { %v1285_v2 = vpop.eup %1284 }
 0x38e   : > { %v848_v1 = vpop.permute.xlu1 %847  ;;  %v758_v6 = vmul.f32 %v1285_v2, %v1277_v52 }
 0x38f   : > { %1178 = vmatprep.subr.mxu0 %v848_v1 }
 0x390   : > { %1179 = vmatpush3.msra.mxu0 %v848_v1 }
 0x391   : > { %v1287_v3 = vpop.eup %1286 }
 0x392   : > { %v756_v4 = vmul.f32 %v1287_v3, %v1279_v54  ;;  %v1289_v5 = vpop.eup %1288 }
 0x393   : > { %v762_v9 = vmul.f32 %v1289_v5, %v1281_v55 }
 0x394   : > { %1175 = vmatprep.mubr.msk.f32.mxu1 %vm718_vm1, %v756_v4 }
 0x395   : > { %v1291_v7 = vpop.eup %1290  ;;  %1176 = vmatmul.mubr.msk.f32.vlgmr.msra.gmra.mrb[4].mxu1 %vm718_vm1, %v758_v6 }
 0x396   : > { %v760_v8 = vmul.f32 %v1291_v7, %v1283_v58 }
 0x398   : > { %1180 = vmatprep.mubr.msk.f32.mxu0 %vm718_vm1, %v760_v8 }
 0x399   : > { %1181 = vmatmul.mubr.msk.f32.vlgmr.msra.gmra.mrb[6].mxu0 %vm718_vm1, %v762_v9 }
 0x468   : > { %v1177_v10 = vpop.f32.mrb[4].mxu1 }
 0x469   : > { %932 = vst.msk [vmem:[%s339_s17 + $0x8] sm:$0xff] %vm360_vm0, %v1177_v10  ;;  %v838_v11 = vpop.f32.mrb[5].mxu1 }
 0x46a   : > { %931 = vst.msk [vmem:[%s339_s17] sm:$0xff] %vm360_vm0, %v838_v11 }
 0x46c   : > { %v1182_v12 = vpop.f32.mrb[6].mxu0 }
 0x46d   : > { %934 = vst.msk [vmem:[%s339_s17 + $0x18] sm:$0xff] %vm360_vm0, %v1182_v12  ;;  %v922_v13 = vpop.f32.mrb[7].mxu0 }
 0x46e   : > { %933 = vst.msk [vmem:[%s339_s17 + $0x10] sm:$0xff] %vm360_vm0, %v922_v13 }
 0x46f   : > { %1421 = shalt.err (!%p1418_p7)
}
 0x470   : > { %s1422_s4 = scalar_lea.hbm %s1836_s26, 512  ;;  %s1426_s27 = scalar_lea.hbm %s1888_s6, 1024 }
 0x471   : > { %p1423_p9 = scmp.ne.s32.totalorder %s1836_s26, %s1422_s4  ;;  %p1427_p11 = scmp.lt.u32.totalorder %s1836_s26, %s1888_s6 }
 0x472   : > { %p1428_p2 = scmp.lt.u32.totalorder %s1426_s27, %s1422_s4  ;;  %p1430_p1 = scmp.lt.u32.totalorder %s1422_s4, %s1836_s26 }
 0x473   : > { %p1424_p0 = pnand %p1423_p9, %p1918_p13 }
 0x474   : > { %p1429_p12 = por %p1428_p2, %p1427_p11 }
 0x475   : > { %p1425_p8 = pneg %p1424_p0 }
 0x476   : > { %p1431_p6 = por %p1430_p1, %p1429_p12 }
 0x478   : > { %p1432_p10 = pnand %p1431_p6, %p1425_p8 }
 0x47a   : > { %1435 = shalt.err (!%p1432_p10)
}
 0x47b   : > { %s1496_s16 = smov 128   ;;  %s1497_s12 = smov 8  }
 0x47c   : > { %1211 = dma.vmem_to_hbm [thread:$0]  (%p1918_p13), %s1830_s7, 512, %s1836_s26, %s936_s25, %s1496_s16, %s1496_s16, %s1497_s12  }
 0x47d PF: > { %s965_s17 = sand.u32 1, %s1474_s21   ;;  %p1919_p4 = scmp.ne.s32.totalorder %s1900_s28, 0 }
 0x47e   : > { %p1920_p5 = scmp.ge.s32.totalorder %s1486_s24, 2  ;;  %s966_s2 = scalar_lea.sflag [#allocation4], %s965_s17 }
 0x480   : > { %p1228_p3 = pnand %p1920_p5, %p1919_p4 }
 0x482   : > { %1469 = dma.done.wait (!%p1228_p3), %s966_s2, 512  }
 0x483   : > { %1471 = vsyncadd (!%p1228_p3), %s966_s2, 4294966784  ;;  %s1921_s30 = sld [smem:[#allocation16_spill]]  ;;  %p23_p7 = scmp.ge.s32.totalorder %s1649_s8, 4  }
 0x484   : > { %s1922_s21 = smov %s1478_s22  ;;  %s1923_s22 = smov %s1482_s23 }
 0x485   : > { %s1925_s24 = smov %s1649_s8  ;;  %25 = sbr.rel (!%p23_p7) target bundleno = 12 (0xc), region = 110 }
 0x489   : > { %s1924_s23 = smov %s1921_s30 }
 0x48c   :  { %971 = vsyncpa [#allocation3], 1 }
 0x48d   :  { %973 = vsyncpa [#allocation3 + $0x1], 1 }
 0x48e   :  { %974 = vsyncpa [#allocation6], 1 }
 0x48f   :  { %976 = vsyncpa [#allocation6 + $0x1], 1 }
 0x490   :  { %977 = vsyncpa [#allocation9], 1 }
 0x491   :  { %978 = vsyncpa [#allocation4], 1 }
 0x492   :  { %980 = vsyncpa [#allocation4 + $0x1], 1 }

</bundles_post_ra>
